<compile_context>
chip_gen: v7x
topology: tpu7x:2x2x1
jax: 0.10.0
libtpu: 0.0.40
codegen_flags: <defaults>
</compile_context>

<pallas_src>
import jax
import jax.numpy as jnp
from jax.experimental import pallas as pl
from jax.experimental.pallas import tpu as pltpu

_LANE = 128   # last dim multiple for lane-dense loads/stores
_SUBLANE = 8  # second-to-last dim multiple


def _round_up(x: int, m: int) -> int:
    return ((x + m - 1) // m) * m


def _device_kind() -> str:
    try:
        return jax.devices()[0].device_kind.lower()
    except Exception:  # pragma: no cover - defensive
        return ""


def _vmem_limit_bytes(kind: str):
    if "v7" in kind or "7x" in kind:
        return 44 << 20          # v7x: 64 MiB physical, leave headroom
    if "v5" in kind or "v6" in kind:
        return 100 << 20         # v5e/v6e: 128 MiB physical
    return None                  # unknown generation: compiler default


def _batch_tiling(M: int, kind: str):
    """Balanced batch tiles; >=2 grid steps on v7x (megacore) when M > 128."""
    is_v7 = ("v7" in kind) or ("7x" in kind)
    tile_cap = 256 if is_v7 else 512
    n_tiles = max(1, -(-M // tile_cap))
    if is_v7 and M > 128:
        n_tiles = max(n_tiles, 2)
    tm = _round_up(-(-M // n_tiles), _SUBLANE)
    m_pad = tm * n_tiles
    return tm, m_pad, n_tiles


def _make_mlp_kernel(tanh_after, compute_dtype, split_rows):
    """Fused MLP kernel over `len(tanh_after)` Linear layers.

    Signature: kernel(x_ref, w0, b0, w1, b1, ..., o_ref).
    tanh_after[i] == True applies Tanh after layer i.
    If split_rows, the batch tile is processed as two independent row-halves so
    the MXU matmul of one half overlaps the VPU/EUP bias+tanh of the other.
    """
    n = len(tanh_after)

    def kernel(x_ref, *refs):
        o_ref = refs[-1]
        wb = refs[:-1]
        assert len(wb) == 2 * n

        def chain(h):
            for layer in range(n):
                w = wb[2 * layer][...]
                b = wb[2 * layer + 1][...]
                # Mixed-precision MXU path: inputs stay in compute dtype,
                # accumulate in f32.
                acc = jnp.dot(h, w, preferred_element_type=jnp.float32)
                acc = acc + b.astype(jnp.float32)   # (1, N) broadcast, f32 VPU
                if tanh_after[layer]:
                    acc = jnp.tanh(acc)             # EUP, f32 (v5e-safe)
                if layer < n - 1:
                    h = acc.astype(compute_dtype)
                else:
                    h = acc
            return h

        if split_rows:
            half = x_ref.shape[0] // 2
            o_ref[:half, :] = chain(x_ref[:half, :]).astype(o_ref.dtype)
            o_ref[half:, :] = chain(x_ref[half:, :]).astype(o_ref.dtype)
        else:
            o_ref[...] = chain(x_ref[...]).astype(o_ref.dtype)

    return kernel


def pad_fcnn_params(params, mxu_dtype=jnp.float32):
    """Hoisted, do-once padding/casting of (W, b) to lane-dense VMEM shapes.

    Weights are stored (in_dim, out_dim), i.e. transpose of nn.Linear, so
    y = x @ W + b. Zero padding is exact (tanh(0) = 0).
    """
    padded = []
    for (w, b) in params:
        fi, fo = w.shape
        fi_p, fo_p = _round_up(fi, _LANE), _round_up(fo, _LANE)
        w_p = jnp.zeros((fi_p, fo_p), mxu_dtype).at[:fi, :fo].set(
            w.astype(mxu_dtype))
        b_p = jnp.zeros((1, fo_p), mxu_dtype).at[0, :fo].set(
            b.astype(mxu_dtype))
        padded.append((w_p, b_p))
    return padded


def _fused_vmem_estimate(padded_params, tm, in_pad, out_pad, out_itemsize):
    p_item = jnp.dtype(padded_params[0][0].dtype).itemsize
    wb_bytes = sum(int(w.size) + int(b.size) for (w, b) in padded_params) * p_item
    max_pad = max([in_pad, out_pad] + [w.shape[1] for (w, _) in padded_params])
    act_bytes = 2 * tm * in_pad * p_item + 2 * tm * out_pad * out_itemsize
    work_bytes = 4 * tm * max_pad * 4  # f32 accumulators / tanh temporaries
    return wb_bytes + act_bytes + work_bytes


def fcnn_11_forward(x, padded_params, output_dim, force_per_layer=False):
    """Forward pass of FCNN_11. `padded_params` comes from pad_fcnn_params."""
    M, input_dim = x.shape
    n_linear = len(padded_params)
    out_dtype = x.dtype
    compute_dtype = padded_params[0][0].dtype

    kind = _device_kind()
    vmem_limit = _vmem_limit_bytes(kind)
    tm, m_pad, n_tiles = _batch_tiling(M, kind)
    in_pad = _round_up(input_dim, _LANE)
    out_pad = padded_params[-1][0].shape[1]

    # Pad / cast activations only (weights already prepared once).
    if m_pad == M and in_pad == input_dim and x.dtype == compute_dtype:
        x_p = x
    else:
        x_p = jnp.zeros((m_pad, in_pad), compute_dtype).at[:M, :input_dim].set(
            x.astype(compute_dtype))

    # Split the batch tile into two row-halves when it is large enough so the
    # two dependence chains can overlap MXU and VPU/EUP work.
    split_rows = (tm % 16 == 0) and (tm >= 64)

    budget = vmem_limit if vmem_limit is not None else (32 << 20)
    est = _fused_vmem_estimate(padded_params, tm, in_pad, out_pad,
                               jnp.dtype(out_dtype).itemsize)
    fused_fits = (not force_per_layer) and (est <= int(0.8 * budget))

    compiler_params = pltpu.CompilerParams(
        dimension_semantics=("parallel",),  # batch tiles are independent
        vmem_limit_bytes=vmem_limit,
    )
    resident = pl.BlockSpec(memory_space=pltpu.MemorySpace.VMEM)  # 1 buffer

    if fused_fits:
        # --- whole network in one kernel launch --------------------------------
        tanh_after = tuple(i < n_linear - 1 for i in range(n_linear))
        kernel = _make_mlp_kernel(tanh_after, compute_dtype, split_rows)

        flat_inputs = [x_p]
        in_specs = [pl.BlockSpec((tm, in_pad), lambda i: (i, 0))]
        for (w_p, b_p) in padded_params:
            flat_inputs += [w_p, b_p]
            in_specs += [resident, resident]

        y_p = pl.pallas_call(
            kernel,
            out_shape=jax.ShapeDtypeStruct((m_pad, out_pad), out_dtype),
            grid=(m_pad // tm,),
            in_specs=in_specs,
            out_specs=pl.BlockSpec((tm, out_pad), lambda i: (i, 0)),
            compiler_params=compiler_params,
        )(*flat_inputs)
    else:
        # --- fallback: one fused (Linear [+Tanh]) kernel per layer -------------
        # Keeps each layer's weight VMEM-resident; activations stream via HBM.
        # TODO(synk): K/N-tiled inner pipeline for a single layer whose weight
        # alone exceeds VMEM.
        h = x_p
        for li, (w_p, b_p) in enumerate(padded_params):
            last = li == n_linear - 1
            fo_p = w_p.shape[1]
            fi_p = h.shape[1]
            layer_kernel = _make_mlp_kernel((not last,), compute_dtype,
                                            split_rows)
            layer_out_dtype = out_dtype if last else compute_dtype
            h = pl.pallas_call(
                layer_kernel,
                out_shape=jax.ShapeDtypeStruct((m_pad, fo_p), layer_out_dtype),
                grid=(m_pad // tm,),
                in_specs=[pl.BlockSpec((tm, fi_p), lambda i: (i, 0)),
                          resident, resident],
                out_specs=pl.BlockSpec((tm, fo_p), lambda i: (i, 0)),
                compiler_params=compiler_params,
            )(h, w_p, b_p)
        y_p = h

    if m_pad == M and out_pad == output_dim:
        return y_p
    return y_p[:M, :output_dim]


def init_fcnn_params(key, input_dim, output_dim, hid_size, num_layers,
                     dtype=jnp.float32):
    """PyTorch nn.Linear-style init: U(-1/sqrt(fan_in), 1/sqrt(fan_in))."""
    params = []
    dims = []
    current_dim = input_dim
    for _ in range(num_layers):
        dims.append((current_dim, hid_size))
        current_dim = hid_size
    dims.append((hid_size, output_dim))
    for (fan_in, fan_out) in dims:
        key, kw, kb = jax.random.split(key, 3)
        bound = 1.0 / jnp.sqrt(jnp.asarray(fan_in, dtype))
        w = jax.random.uniform(kw, (fan_in, fan_out), dtype,
                               minval=-bound, maxval=bound)
        b = jax.random.uniform(kb, (fan_out,), dtype,
                               minval=-bound, maxval=bound)
        params.append((w, b))
    return params


def fcnn_11_ref(x, params):
    h = x
    n = len(params)
    for idx, (w, b) in enumerate(params):
        h = h @ w + b
        if idx < n - 1:
            h = jnp.tanh(h)
    return h


if __name__ == "__main__":
    input_dim, hid_size, output_dim, num_layers = 32, 32, 16, 3

    key = jax.random.PRNGKey(0)
    key, kx1, kx2 = jax.random.split(key, 3)
    params = init_fcnn_params(key, input_dim, output_dim, hid_size, num_layers)

    fwd = jax.jit(fcnn_11_forward, static_argnums=(2, 3))

    # f32 path, small batch (strict tolerance).
    x = jax.random.normal(kx1, (8, input_dim), jnp.float32)
    p_f32 = pad_fcnn_params(params, jnp.float32)
    out = jax.block_until_ready(fwd(x, p_f32, output_dim, False))
    ref = fcnn_11_ref(x, params)
    assert out.shape == (8, output_dim)
    assert jnp.allclose(out, ref, atol=1e-5, rtol=1e-5), "f32 small-batch mismatch"

    # f32 path, awkward batch (balanced tiles + in-kernel row split, strict).
    x2 = jax.random.normal(kx2, (272, input_dim), jnp.float32)
    out2 = jax.block_until_ready(fwd(x2, p_f32, output_dim, False))
    ref2 = fcnn_11_ref(x2, params)
    assert out2.shape == (272, output_dim)
    assert jnp.allclose(out2, ref2, atol=1e-5, rtol=1e-5), "f32 batch-272 mismatch"

    # Forced per-layer fallback path (VMEM-budget guard exercised, strict).
    out3 = jax.block_until_ready(fwd(x, p_f32, output_dim, True))
    assert jnp.allclose(out3, ref, atol=1e-5, rtol=1e-5), "per-layer fallback mismatch"

    # bf16 MXU fast path (v6e/v7x ~2x MXU throughput), loose tolerance.
    p_bf16 = pad_fcnn_params(params, jnp.bfloat16)
    out4 = jax.block_until_ready(fwd(x, p_bf16, output_dim, False))
    assert out4.shape == (8, output_dim) and out4.dtype == jnp.float32
    assert jnp.allclose(out4, ref, atol=5e-2, rtol=5e-2), "bf16 path mismatch"

    print("KERNEL_OK")
</pallas_src>

<mosaic_0001>
module attributes {stable_mosaic.version = 11 : i64} {
  func.func @kernel(%arg0: i32, %arg1: memref<8x128xf32, #tpu.memory_space<vmem>>, %arg2: memref<128x128xf32, #tpu.memory_space<vmem>>, %arg3: memref<1x128xf32, #tpu.memory_space<vmem>>, %arg4: memref<128x128xf32, #tpu.memory_space<vmem>>, %arg5: memref<1x128xf32, #tpu.memory_space<vmem>>, %arg6: memref<128x128xf32, #tpu.memory_space<vmem>>, %arg7: memref<1x128xf32, #tpu.memory_space<vmem>>, %arg8: memref<128x128xf32, #tpu.memory_space<vmem>>, %arg9: memref<1x128xf32, #tpu.memory_space<vmem>>, %arg10: memref<8x128xf32, #tpu.memory_space<vmem>>) attributes {dimension_semantics = [#tpu.dimension_semantics<parallel>], iteration_bounds = array<i64: 1>, scalar_prefetch = 0 : i64, scratch_operands = 0 : i64, tpu.core_type = #tpu.core_type<tc>, window_params = [{transform_indices = @transform_0, window_bounds = array<i64: 8, 128>}, {pipeline_mode = #tpu.pipeline_mode<synchronous>, transform_indices = @transform_1, window_bounds = array<i64: 128, 128>}, {pipeline_mode = #tpu.pipeline_mode<synchronous>, transform_indices = @transform_2, window_bounds = array<i64: 1, 128>}, {pipeline_mode = #tpu.pipeline_mode<synchronous>, transform_indices = @transform_3, window_bounds = array<i64: 128, 128>}, {pipeline_mode = #tpu.pipeline_mode<synchronous>, transform_indices = @transform_4, window_bounds = array<i64: 1, 128>}, {pipeline_mode = #tpu.pipeline_mode<synchronous>, transform_indices = @transform_5, window_bounds = array<i64: 128, 128>}, {pipeline_mode = #tpu.pipeline_mode<synchronous>, transform_indices = @transform_6, window_bounds = array<i64: 1, 128>}, {pipeline_mode = #tpu.pipeline_mode<synchronous>, transform_indices = @transform_7, window_bounds = array<i64: 128, 128>}, {pipeline_mode = #tpu.pipeline_mode<synchronous>, transform_indices = @transform_8, window_bounds = array<i64: 1, 128>}, {transform_indices = @transform_9, window_bounds = array<i64: 8, 128>}]} {
    %c0 = arith.constant 0 : index
    %c0_0 = arith.constant 0 : index
    %0 = vector.load %arg1[%c0, %c0_0] : memref<8x128xf32, #tpu.memory_space<vmem>>, vector<8x128xf32>
    %c0_1 = arith.constant 0 : index
    %c0_2 = arith.constant 0 : index
    %1 = vector.load %arg2[%c0_1, %c0_2] : memref<128x128xf32, #tpu.memory_space<vmem>>, vector<128x128xf32>
    %c0_3 = arith.constant 0 : index
    %c0_4 = arith.constant 0 : index
    %2 = vector.load %arg3[%c0_3, %c0_4] : memref<1x128xf32, #tpu.memory_space<vmem>>, vector<1x128xf32>
    %cst = arith.constant dense<0.000000e+00> : vector<8x128xf32>
    %3 = tpu.matmul %0, %1, %cst {dimension_numbers = #tpu.dot_dimension_numbers<[1], [0], [0], [1], [0, 0, 1, 1], [], []>} : vector<8x128xf32>, vector<128x128xf32>, vector<8x128xf32> -> vector<8x128xf32>
    %4 = vector.broadcast %2 : vector<1x128xf32> to vector<8x128xf32>
    %5 = arith.addf %3, %4 : vector<8x128xf32>
    %6 = math.tanh %5 : vector<8x128xf32>
    %c0_5 = arith.constant 0 : index
    %c0_6 = arith.constant 0 : index
    %7 = vector.load %arg4[%c0_5, %c0_6] : memref<128x128xf32, #tpu.memory_space<vmem>>, vector<128x128xf32>
    %c0_7 = arith.constant 0 : index
    %c0_8 = arith.constant 0 : index
    %8 = vector.load %arg5[%c0_7, %c0_8] : memref<1x128xf32, #tpu.memory_space<vmem>>, vector<1x128xf32>
    %cst_9 = arith.constant dense<0.000000e+00> : vector<8x128xf32>
    %9 = tpu.matmul %6, %7, %cst_9 {dimension_numbers = #tpu.dot_dimension_numbers<[1], [0], [0], [1], [0, 0, 1, 1], [], []>} : vector<8x128xf32>, vector<128x128xf32>, vector<8x128xf32> -> vector<8x128xf32>
    %10 = vector.broadcast %8 : vector<1x128xf32> to vector<8x128xf32>
    %11 = arith.addf %9, %10 : vector<8x128xf32>
    %12 = math.tanh %11 : vector<8x128xf32>
    %c0_10 = arith.constant 0 : index
    %c0_11 = arith.constant 0 : index
    %13 = vector.load %arg6[%c0_10, %c0_11] : memref<128x128xf32, #tpu.memory_space<vmem>>, vector<128x128xf32>
    %c0_12 = arith.constant 0 : index
    %c0_13 = arith.constant 0 : index
    %14 = vector.load %arg7[%c0_12, %c0_13] : memref<1x128xf32, #tpu.memory_space<vmem>>, vector<1x128xf32>
    %cst_14 = arith.constant dense<0.000000e+00> : vector<8x128xf32>
    %15 = tpu.matmul %12, %13, %cst_14 {dimension_numbers = #tpu.dot_dimension_numbers<[1], [0], [0], [1], [0, 0, 1, 1], [], []>} : vector<8x128xf32>, vector<128x128xf32>, vector<8x128xf32> -> vector<8x128xf32>
    %16 = vector.broadcast %14 : vector<1x128xf32> to vector<8x128xf32>
    %17 = arith.addf %15, %16 : vector<8x128xf32>
    %18 = math.tanh %17 : vector<8x128xf32>
    %c0_15 = arith.constant 0 : index
    %c0_16 = arith.constant 0 : index
    %19 = vector.load %arg8[%c0_15, %c0_16] : memref<128x128xf32, #tpu.memory_space<vmem>>, vector<128x128xf32>
    %c0_17 = arith.constant 0 : index
    %c0_18 = arith.constant 0 : index
    %20 = vector.load %arg9[%c0_17, %c0_18] : memref<1x128xf32, #tpu.memory_space<vmem>>, vector<1x128xf32>
    %cst_19 = arith.constant dense<0.000000e+00> : vector<8x128xf32>
    %21 = tpu.matmul %18, %19, %cst_19 {dimension_numbers = #tpu.dot_dimension_numbers<[1], [0], [0], [1], [0, 0, 1, 1], [], []>} : vector<8x128xf32>, vector<128x128xf32>, vector<8x128xf32> -> vector<8x128xf32>
    %22 = vector.broadcast %20 : vector<1x128xf32> to vector<8x128xf32>
    %23 = arith.addf %21, %22 : vector<8x128xf32>
    %c0_20 = arith.constant 0 : index
    %c0_21 = arith.constant 0 : index
    %24 = vector.load %arg10[%c0_20, %c0_21] : memref<8x128xf32, #tpu.memory_space<vmem>>, vector<8x128xf32>
    tpu.vector_store %arg10[%c0_20, %c0_21], %23 {strides = array<i32>} : memref<8x128xf32, #tpu.memory_space<vmem>>, vector<8x128xf32>,
    return
  }
  func.func @transform_0(%arg0: i32) -> (i32, i32) {
    %c0_i32 = arith.constant 0 : i32
    %c0_i32_0 = arith.constant 0 : i32
    return %arg0, %c0_i32 : i32, i32
  }
  func.func @transform_1(%arg0: i32) -> (i32, i32) {
    %c0_i32 = arith.constant 0 : i32
    %c0_i32_0 = arith.constant 0 : i32
    %c0_i32_1 = arith.constant 0 : i32
    return %c0_i32, %c0_i32_0 : i32, i32
  }
  func.func @transform_2(%arg0: i32) -> (i32, i32) {
    %c0_i32 = arith.constant 0 : i32
    %c0_i32_0 = arith.constant 0 : i32
    %c0_i32_1 = arith.constant 0 : i32
    return %c0_i32, %c0_i32_0 : i32, i32
  }
  func.func @transform_3(%arg0: i32) -> (i32, i32) {
    %c0_i32 = arith.constant 0 : i32
    %c0_i32_0 = arith.constant 0 : i32
    %c0_i32_1 = arith.constant 0 : i32
    return %c0_i32, %c0_i32_0 : i32, i32
  }
  func.func @transform_4(%arg0: i32) -> (i32, i32) {
    %c0_i32 = arith.constant 0 : i32
    %c0_i32_0 = arith.constant 0 : i32
    %c0_i32_1 = arith.constant 0 : i32
    return %c0_i32, %c0_i32_0 : i32, i32
  }
  func.func @transform_5(%arg0: i32) -> (i32, i32) {
    %c0_i32 = arith.constant 0 : i32
    %c0_i32_0 = arith.constant 0 : i32
    %c0_i32_1 = arith.constant 0 : i32
    return %c0_i32, %c0_i32_0 : i32, i32
  }
  func.func @transform_6(%arg0: i32) -> (i32, i32) {
    %c0_i32 = arith.constant 0 : i32
    %c0_i32_0 = arith.constant 0 : i32
    %c0_i32_1 = arith.constant 0 : i32
    return %c0_i32, %c0_i32_0 : i32, i32
  }
  func.func @transform_7(%arg0: i32) -> (i32, i32) {
    %c0_i32 = arith.constant 0 : i32
    %c0_i32_0 = arith.constant 0 : i32
    %c0_i32_1 = arith.constant 0 : i32
    return %c0_i32, %c0_i32_0 : i32, i32
  }
  func.func @transform_8(%arg0: i32) -> (i32, i32) {
    %c0_i32 = arith.constant 0 : i32
    %c0_i32_0 = arith.constant 0 : i32
    %c0_i32_1 = arith.constant 0 : i32
    return %c0_i32, %c0_i32_0 : i32, i32
  }
  func.func @transform_9(%arg0: i32) -> (i32, i32) {
    %c0_i32 = arith.constant 0 : i32
    %c0_i32_0 = arith.constant 0 : i32
    return %arg0, %c0_i32 : i32, i32
  }
}

</mosaic_0001>

<bundles_post_ra>
// kernel: fcnn_11_forward.1
= control target key start
LH: loop header
LB: loop body
LE: loop exit
PB: predicated region body
PF: predicated region fallthrough
CT: control target
= control target key end

     0   :  { %14 = vsyncpa [#allocation3], 0  ;;  %s1125_s0 = inlined_call_operand.vmem [shape: f32[8,128], index: 0, kind: input, shape index: {}]   ;;  %s1126_s1 = inlined_call_operand.hbm [shape: f32[128,128], index: 1, kind: input, shape index: {}]   ;;  %s1127_s2 = inlined_call_operand.vmem [shape: f32[1,128], index: 2, kind: input, shape index: {}]   ;;  %s1128_s3 = inlined_call_operand.hbm [shape: f32[128,128], index: 3, kind: input, shape index: {}]   ;;  %s1129_s4 = inlined_call_operand.vmem [shape: f32[1,128], index: 4, kind: input, shape index: {}]   ;;  %s1130_s5 = inlined_call_operand.hbm [shape: f32[128,128], index: 5, kind: input, shape index: {}]   ;;  %s1131_s6 = inlined_call_operand.vmem [shape: f32[1,128], index: 6, kind: input, shape index: {}]   ;;  %s1132_s7 = inlined_call_operand.hbm [shape: f32[128,128], index: 7, kind: input, shape index: {}]   ;;  %s1133_s8 = inlined_call_operand.vmem [shape: f32[1,128], index: 8, kind: input, shape index: {}]   ;;  %s1134_s9 = inlined_call_operand.hbm [shape: f32[8,128], index: 9, kind: output, shape index: {}]  }
   0x1   :  { %15 = vsyncpa [#allocation6], 0 }
   0x2   :  { %16 = vsyncpa [#allocation9], 0 }
   0x3   :  { %17 = vsyncpa [#allocation4], 0  ;;  %s924_s30 = smov [#allocation5]   ;;  %s925_s11 = smov [#allocation2]  }
   0x4   :  { %s39_s10 = sshll.u32 %s924_s30, 4  ;;  %s25_s12 = sshll.u32 %s925_s11, 4  ;;  %s40_s10 = int_to_ptr.vmem [resolvable:$true] %s39_s10  ;;  %s984_s12 = int_to_ptr.vmem [resolvable:$true] %s25_s12 }
   0x5   :  { %s806_s15 = scalar_lea.hbm %s1128_s3, 2048 }
   0x6   :  { %p807_p0 = scmp.ne.s32.totalorder %s1128_s3, %s806_s15  ;;  %p810_p1 = scmp.lt.u32.totalorder %s806_s15, %s1128_s3 }
   0x8   :  { %p812_p2 = pnand %p810_p1, %p807_p0 }
   0xa   :  { %815 = shalt.err (!%p812_p2)
}
   0xb   :  { %s816_s20 = scalar_lea.vmem %s40_s10, 2048  ;;  %p821_p4 = scmp.lt.s32.totalorder %s40_s10, %s40_s10 }
   0xc   :  { %p817_p3 = scmp.ne.s32.totalorder %s40_s10, %s816_s20  ;;  %p822_p5 = scmp.lt.s32.totalorder %s816_s20, %s816_s20 }
   0xe   :  { %p823_p6 = por %p822_p5, %p821_p4 }
  0x10   :  { %p824_p7 = pnand %p823_p6, %p817_p3 }
  0x12   :  { %827 = shalt.err (!%p824_p7)
}
  0x13   :  { %s926_s21 = smov 128   ;;  %s927_s22 = smov 8  }
  0x14   :  { %45 = dma.hbm_to_vmem [thread:$0]  %s1128_s3, 2048, %s40_s10, [#allocation6], %s926_s21, %s926_s21, %s927_s22  }
  0x15   :  { %s828_s27 = scalar_lea.hbm %s1126_s1, 2048 }
  0x16   :  { %p829_p8 = scmp.ne.s32.totalorder %s1126_s1, %s828_s27  ;;  %p832_p9 = scmp.lt.u32.totalorder %s828_s27, %s1126_s1 }
  0x18   :  { %p834_p10 = pnand %p832_p9, %p829_p8 }
  0x1a   :  { %837 = shalt.err (!%p834_p10)
}
  0x1b   :  { %s838_s13 = scalar_lea.vmem %s984_s12, 2048  ;;  %p843_p12 = scmp.lt.s32.totalorder %s984_s12, %s984_s12 }
  0x1c   :  { %p839_p11 = scmp.ne.s32.totalorder %s984_s12, %s838_s13  ;;  %p844_p13 = scmp.lt.s32.totalorder %s838_s13, %s838_s13 }
  0x1e   :  { %p845_p0 = por %p844_p13, %p843_p12 }
  0x20   :  { %p846_p1 = pnand %p845_p0, %p839_p11 }
  0x22   :  { %849 = shalt.err (!%p846_p1)
}
  0x23   :  { %31 = dma.hbm_to_vmem [thread:$0]  %s1126_s1, 2048, %s984_s12, [#allocation3], %s926_s21, %s926_s21, %s927_s22  }
  0x24   :  { %s928_s14 = smov [#allocation7]   ;;  %s929_s16 = smov [#allocation8]  }
  0x25   :  { %s53_s15 = sshll.u32 %s928_s14, 4  ;;  %s67_s17 = sshll.u32 %s929_s16, 4  ;;  %s54_s15 = int_to_ptr.vmem [resolvable:$true] %s53_s15  ;;  %s1021_s17 = int_to_ptr.vmem [resolvable:$true] %s67_s17 }
  0x26   :  { %s850_s20 = scalar_lea.hbm %s1130_s5, 2048 }
  0x27   :  { %p851_p2 = scmp.ne.s32.totalorder %s1130_s5, %s850_s20  ;;  %p854_p3 = scmp.lt.u32.totalorder %s850_s20, %s1130_s5 }
  0x29   :  { %p856_p4 = pnand %p854_p3, %p851_p2 }
  0x2b   :  { %859 = shalt.err (!%p856_p4)
}
  0x2c   :  { %s860_s1 = scalar_lea.vmem %s54_s15, 2048  ;;  %p865_p6 = scmp.lt.s32.totalorder %s54_s15, %s54_s15 }
  0x2d   :  { %p861_p5 = scmp.ne.s32.totalorder %s54_s15, %s860_s1  ;;  %p866_p7 = scmp.lt.s32.totalorder %s860_s1, %s860_s1 }
  0x2f   :  { %p867_p8 = por %p866_p7, %p865_p6 }
  0x31   :  { %p868_p9 = pnand %p867_p8, %p861_p5 }
  0x33   :  { %871 = shalt.err (!%p868_p9)
}
  0x34   :  { %59 = dma.hbm_to_vmem [thread:$0]  %s1130_s5, 2048, %s54_s15, [#allocation6], %s926_s21, %s926_s21, %s927_s22  }
  0x35   :  { %s872_s30 = scalar_lea.hbm %s1132_s7, 2048 }
  0x36   :  { %p873_p10 = scmp.ne.s32.totalorder %s1132_s7, %s872_s30  ;;  %p876_p11 = scmp.lt.u32.totalorder %s872_s30, %s1132_s7 }
  0x38   :  { %p878_p12 = pnand %p876_p11, %p873_p10 }
  0x3a   :  { %881 = shalt.err (!%p878_p12)
}
  0x3b   :  { %s882_s14 = scalar_lea.vmem %s1021_s17, 2048  ;;  %p887_p0 = scmp.lt.s32.totalorder %s1021_s17, %s1021_s17 }
  0x3c   :  { %p883_p13 = scmp.ne.s32.totalorder %s1021_s17, %s882_s14  ;;  %p888_p1 = scmp.lt.s32.totalorder %s882_s14, %s882_s14 }
  0x3e   :  { %p889_p2 = por %p888_p1, %p887_p0 }
  0x40   :  { %p890_p3 = pnand %p889_p2, %p883_p13 }
  0x42   :  { %893 = shalt.err (!%p890_p3)
}
  0x43   :  { %73 = dma.hbm_to_vmem [thread:$0]  %s1132_s7, 2048, %s1021_s17, [#allocation9], %s926_s21, %s926_s21, %s927_s22  }
  0x44   :  { %916 = dma.done.wait [#allocation3], 2048  }
  0x45   :  { %917 = vsyncadd [#allocation3], 4294965248 }
  0x46   :  { %918 = dma.done.wait [#allocation6], 4096  }
  0x47   :  { %919 = vsyncadd [#allocation6], 4294963200 }
  0x48   :  { %920 = dma.done.wait [#allocation9], 2048  }
  0x49   :  { %921 = vsyncadd [#allocation9], 4294965248  ;;  %v930_v0 = vmov 0.0|0.0   ;;  %vm931_vm0 = vmmov 0   ;;  %v932_v1 = vmov 0.0   ;;  %v89_v2 = vld [vmem:[#allocation2] sm:$0xff] }
  0x4a   :  { %694 = vmatprep.subr.bf16.mxu0 %v930_v0  ;;  %586 = vmatprep.mubr.msk.f32.mxu0 %vm931_vm0, %v932_v1  ;;  %v90_v3 = vld [vmem:[#allocation2 + $0x8] sm:$0xff]  ;;  %v91_v4 = vld [vmem:[#allocation2 + $0x10] sm:$0xff]  ;;  %v92_v6 = vld [vmem:[#allocation2 + $0x18] sm:$0xff]  ;;  %s933_s20 = smov [#allocation10]  }
  0x4b   :  { %718 = vmatprep.subr.bf16.mxu1 %v930_v0  ;;  %621 = vmatprep.mubr.msk.f32.mxu1 %vm931_vm0, %v932_v1  ;;  %v695_v5 = vpack.c.bf16 %v90_v3, %v89_v2  ;;  %v698_v7 = vpack.c.bf16 %v92_v6, %v91_v4  ;;  %v93_v8 = vld [vmem:[#allocation2 + $0x20] sm:$0xff]  ;;  %v94_v9 = vld [vmem:[#allocation2 + $0x28] sm:$0xff]  ;;  %v185_v12 = vld [vmem:[#allocation5 + $0x10] sm:$0xff]  ;;  %s471_s23 = sshll.u32 %s933_s20, 4  ;;  %s472_s23 = int_to_ptr.vmem [resolvable:$true] %s471_s23 }
  0x4c   :  { %v183_v10 = vld [vmem:[#allocation5] sm:$0xff]  ;;  %v184_v11 = vld [vmem:[#allocation5 + $0x8] sm:$0xff]  ;;  %v186_v13 = vld [vmem:[#allocation5 + $0x18] sm:$0xff]  ;;  %v701_v14 = vpack.c.bf16 %v94_v9, %v93_v8  ;;  %s894_s24 = scalar_lea.vmem %s472_s23, 128  ;;  %p899_p5 = scmp.lt.s32.totalorder %s472_s23, %s472_s23 }
  0x4d   :  { %696 = vmatpush3.bf16.msra.mxu0 %v695_v5  ;;  %v719_v15 = vpack.c.bf16 %v184_v11, %v183_v10  ;;  %v95_v16 = vld [vmem:[#allocation2 + $0x30] sm:$0xff]  ;;  %v96_v17 = vld [vmem:[#allocation2 + $0x38] sm:$0xff]  ;;  %v722_v18 = vpack.c.bf16 %v186_v13, %v185_v12  ;;  %v187_v19 = vld [vmem:[#allocation5 + $0x20] sm:$0xff]  ;;  %p895_p4 = scmp.ne.s32.totalorder %s472_s23, %s894_s24  ;;  %p900_p6 = scmp.lt.s32.totalorder %s894_s24, %s894_s24 }
  0x4e   :  { %697 = vmatprep.subr.bf16.mxu0 %v930_v0  ;;  %v188_v20 = vld [vmem:[#allocation5 + $0x28] sm:$0xff]  ;;  %v704_v21 = vpack.c.bf16 %v96_v17, %v95_v16  ;;  %v97_v22 = vld [vmem:[#allocation2 + $0x40] sm:$0xff]  ;;  %v189_v25 = vld [vmem:[#allocation5 + $0x30] sm:$0xff] }
  0x4f   :  { %720 = vmatpush3.bf16.msra.mxu1 %v719_v15  ;;  %v98_v23 = vld [vmem:[#allocation2 + $0x48] sm:$0xff]  ;;  %v725_v24 = vpack.c.bf16 %v188_v20, %v187_v19  ;;  %v190_v26 = vld [vmem:[#allocation5 + $0x38] sm:$0xff]  ;;  %v99_v28 = vld [vmem:[#allocation2 + $0x50] sm:$0xff]  ;;  %p901_p7 = por %p900_p6, %p899_p5 }
  0x50   :  { %721 = vmatprep.subr.bf16.mxu1 %v930_v0  ;;  %v707_v27 = vpack.c.bf16 %v98_v23, %v97_v22  ;;  %v100_v29 = vld [vmem:[#allocation2 + $0x58] sm:$0xff]  ;;  %v728_v30 = vpack.c.bf16 %v190_v26, %v189_v25  ;;  %v191_v31 = vld [vmem:[#allocation5 + $0x40] sm:$0xff]  ;;  %v192_v32 = vld [vmem:[#allocation5 + $0x48] sm:$0xff] }
  0x51   :  { %699 = vmatpush3.bf16.msra.mxu0 %v698_v7  ;;  %v710_v33 = vpack.c.bf16 %v100_v29, %v99_v28  ;;  %v101_v34 = vld [vmem:[#allocation2 + $0x60] sm:$0xff]  ;;  %v102_v35 = vld [vmem:[#allocation2 + $0x68] sm:$0xff]  ;;  %v731_v36 = vpack.c.bf16 %v192_v32, %v191_v31  ;;  %v103_v38 = vld [vmem:[#allocation2 + $0x70] sm:$0xff]  ;;  %p902_p8 = pnand %p901_p7, %p895_p4 }
  0x52   :  { %700 = vmatprep.subr.bf16.mxu0 %v930_v0  ;;  %v713_v37 = vpack.c.bf16 %v102_v35, %v101_v34  ;;  %v104_v39 = vld [vmem:[#allocation2 + $0x78] sm:$0xff]  ;;  %v88_v41 = vld [vmem:[%s1125_s0] sm:$0xff]  ;;  %v193_v42 = vld [vmem:[#allocation5 + $0x50] sm:$0xff] }
  0x53   :  { %723 = vmatpush3.bf16.msra.mxu1 %v722_v18  ;;  %v716_v40 = vpack.c.bf16 %v104_v39, %v103_v38  ;;  %v194_v43 = vld [vmem:[#allocation5 + $0x58] sm:$0xff]  ;;  %v195_v45 = vld [vmem:[#allocation5 + $0x60] sm:$0xff]  ;;  %v196_v46 = vld [vmem:[#allocation5 + $0x68] sm:$0xff] }
  0x54   :  { %724 = vmatprep.subr.bf16.mxu1 %v930_v0  ;;  %v734_v44 = vpack.c.bf16 %v194_v43, %v193_v42  ;;  %v737_v47 = vpack.c.bf16 %v196_v46, %v195_v45  ;;  %v197_v48 = vld [vmem:[#allocation5 + $0x70] sm:$0xff]  ;;  %v198_v49 = vld [vmem:[#allocation5 + $0x78] sm:$0xff]  ;;  %v277_v51 = vld [vmem:[#allocation7] sm:$0xff] }
  0x55   :  { %702 = vmatpush3.bf16.msra.mxu0 %v701_v14  ;;  %v740_v50 = vpack.c.bf16 %v198_v49, %v197_v48  ;;  %v278_v52 = vld [vmem:[#allocation7 + $0x8] sm:$0xff]  ;;  %v279_v53 = vld [vmem:[#allocation7 + $0x10] sm:$0xff]  ;;  %v280_v55 = vld [vmem:[#allocation7 + $0x18] sm:$0xff] }
  0x56   :  { %703 = vmatprep.subr.bf16.mxu0 %v930_v0  ;;  %v743_v54 = vpack.c.bf16 %v278_v52, %v277_v51  ;;  %v746_v56 = vpack.c.bf16 %v280_v55, %v279_v53  ;;  %v281_v57 = vld [vmem:[#allocation7 + $0x20] sm:$0xff]  ;;  %v282_v58 = vld [vmem:[#allocation7 + $0x28] sm:$0xff]  ;;  %v283_v60 = vld [vmem:[#allocation7 + $0x30] sm:$0xff] }
  0x57   :  { %726 = vmatpush3.bf16.msra.mxu1 %v725_v24  ;;  %v749_v59 = vpack.c.bf16 %v282_v58, %v281_v57  ;;  %v284_v61 = vld [vmem:[#allocation7 + $0x38] sm:$0xff]  ;;  %v285_v63 = vld [vmem:[#allocation7 + $0x40] sm:$0xff]  ;;  %v286_v2 = vld [vmem:[#allocation7 + $0x48] sm:$0xff] }
  0x58   :  { %727 = vmatprep.subr.bf16.mxu1 %v930_v0  ;;  %v752_v62 = vpack.c.bf16 %v284_v61, %v283_v60  ;;  %v755_v3 = vpack.c.bf16 %v286_v2, %v285_v63  ;;  %v482_v4 = vld [vmem:[%s1127_s2] ss:$0 sm:$0xff]  ;;  %v287_v9 = vld [vmem:[#allocation7 + $0x50] sm:$0xff]  ;;  %v288_v10 = vld [vmem:[#allocation7 + $0x58] sm:$0xff] }
  0x59   :  { %705 = vmatpush3.bf16.msra.mxu0 %v704_v21  ;;  %v758_v11 = vpack.c.bf16 %v288_v10, %v287_v9  ;;  %v289_v12 = vld [vmem:[#allocation7 + $0x60] sm:$0xff]  ;;  %v290_v13 = vld [vmem:[#allocation7 + $0x68] sm:$0xff]  ;;  %v291_v15 = vld [vmem:[#allocation7 + $0x70] sm:$0xff] }
  0x5a   :  { %706 = vmatprep.subr.bf16.mxu0 %v930_v0  ;;  %v761_v14 = vpack.c.bf16 %v290_v13, %v289_v12  ;;  %v292_v16 = vld [vmem:[#allocation7 + $0x78] sm:$0xff]  ;;  %v371_v18 = vld [vmem:[#allocation8] sm:$0xff]  ;;  %v372_v19 = vld [vmem:[#allocation8 + $0x8] sm:$0xff] }
  0x5b   :  { %729 = vmatpush3.bf16.msra.mxu1 %v728_v30  ;;  %v764_v17 = vpack.c.bf16 %v292_v16, %v291_v15  ;;  %v373_v20 = vld [vmem:[#allocation8 + $0x10] sm:$0xff]  ;;  %v374_v21 = vld [vmem:[#allocation8 + $0x18] sm:$0xff]  ;;  %v375_v23 = vld [vmem:[#allocation8 + $0x20] sm:$0xff] }
  0x5c   :  { %730 = vmatprep.subr.bf16.mxu1 %v930_v0  ;;  %v770_v22 = vpack.c.bf16 %v374_v21, %v373_v20  ;;  %v376_v24 = vld [vmem:[#allocation8 + $0x28] sm:$0xff]  ;;  %v377_v26 = vld [vmem:[#allocation8 + $0x30] sm:$0xff]  ;;  %v379_v29 = vld [vmem:[#allocation8 + $0x40] sm:$0xff] }
  0x5d   :  { %708 = vmatpush3.bf16.msra.mxu0 %v707_v27  ;;  %v773_v25 = vpack.c.bf16 %v376_v24, %v375_v23  ;;  %v378_v27 = vld [vmem:[#allocation8 + $0x38] sm:$0xff]  ;;  %v380_v30 = vld [vmem:[#allocation8 + $0x48] sm:$0xff]  ;;  %v483_v32 = vld [vmem:[%s1129_s4] ss:$0 sm:$0xff] }
  0x5e   :  { %709 = vmatprep.subr.bf16.mxu0 %v930_v0  ;;  %v776_v28 = vpack.c.bf16 %v378_v27, %v377_v26  ;;  %v779_v31 = vpack.c.bf16 %v380_v30, %v379_v29  ;;  %v382_v38 = vld [vmem:[#allocation8 + $0x58] sm:$0xff]  ;;  %v385_v43 = vld [vmem:[#allocation8 + $0x70] sm:$0xff]  ;;  %v484_v46 = vld [vmem:[%s1131_s6] ss:$0 sm:$0xff] }
  0x5f   :  { %732 = vmatpush3.bf16.msra.mxu1 %v731_v36  ;;  %v485_v51 = vld [vmem:[%s1133_s8] ss:$0 sm:$0xff] }
  0x60   :  { %733 = vmatprep.subr.bf16.mxu1 %v930_v0 }
  0x61   :  { %711 = vmatpush3.bf16.msra.mxu0 %v710_v33 }
  0x62   :  { %712 = vmatprep.subr.bf16.mxu0 %v930_v0 }
  0x63   :  { %735 = vmatpush3.bf16.msra.mxu1 %v734_v44  ;;  %v386_v44 = vld [vmem:[#allocation8 + $0x78] sm:$0xff] }
  0x64   :  { %736 = vmatprep.subr.bf16.mxu1 %v930_v0  ;;  %v788_v45 = vpack.c.bf16 %v386_v44, %v385_v43 }
  0x65   :  { %714 = vmatpush3.bf16.msra.mxu0 %v713_v37  ;;  %v381_v37 = vld [vmem:[#allocation8 + $0x50] sm:$0xff] }
  0x66   :  { %715 = vmatprep.subr.bf16.mxu0 %v930_v0  ;;  %v782_v39 = vpack.c.bf16 %v382_v38, %v381_v37 }
  0x67   :  { %738 = vmatpush3.bf16.msra.mxu1 %v737_v47 }
  0x68   :  { %739 = vmatprep.subr.bf16.mxu1 %v930_v0 }
  0x69   :  { %717 = vmatpush3.bf16.msra.mxu0 %v716_v40  ;;  %v383_v40 = vld [vmem:[#allocation8 + $0x60] sm:$0xff] }
  0x6a   :  { %742 = vmatprep.subr.bf16.mxu0 %v930_v0 }
  0x6b   :  { %741 = vmatpush3.bf16.msra.mxu1 %v740_v50 }
  0x6c   :  { %587 = vmatmul.mubr.f32.vlgmr.msra.gmra.mrb[0].mxu0 %v88_v41  ;;  %766 = vmatprep.subr.bf16.mxu1 %v930_v0  ;;  %v384_v41 = vld [vmem:[#allocation8 + $0x68] sm:$0xff] }
  0x6d   :  { %656 = vmatprep.mubr.msk.f32.mxu0 %vm931_vm0, %v932_v1  ;;  %744 = vmatpush3.bf16.msra.mxu0 %v743_v54  ;;  %v785_v42 = vpack.c.bf16 %v384_v41, %v383_v40 }
  0x6e   :  { %745 = vmatprep.subr.bf16.mxu0 %v930_v0 }
  0x71   :  { %747 = vmatpush3.bf16.msra.mxu0 %v746_v56 }
  0x72   :  { %748 = vmatprep.subr.bf16.mxu0 %v930_v0 }
  0x75   :  { %750 = vmatpush3.bf16.msra.mxu0 %v749_v59 }
  0x76   :  { %751 = vmatprep.subr.bf16.mxu0 %v930_v0 }
  0x79   :  { %753 = vmatpush3.bf16.msra.mxu0 %v752_v62 }
  0x7a   :  { %754 = vmatprep.subr.bf16.mxu0 %v930_v0 }
  0x7d   :  { %756 = vmatpush3.bf16.msra.mxu0 %v755_v3 }
  0x7e   :  { %757 = vmatprep.subr.bf16.mxu0 %v930_v0 }
  0x81   :  { %759 = vmatpush3.bf16.msra.mxu0 %v758_v11 }
  0x82   :  { %760 = vmatprep.subr.bf16.mxu0 %v930_v0 }
  0x85   :  { %762 = vmatpush3.bf16.msra.mxu0 %v761_v14 }
  0x86   :  { %763 = vmatprep.subr.bf16.mxu0 %v930_v0 }
  0x89   :  { %765 = vmatpush3.bf16.msra.mxu0 %v764_v17 }
 0x13f   :  { %v178_v5 = vpop.f32.mrb[0].mxu0 }
 0x140   :  { %v179_v6 = vadd.f32 %v482_v4, %v178_v5  ;;  %v588_v7 = vpop.f32.mrb[1].mxu0 }
 0x142   :  { %800 = vtanh.f32 %v179_v6 }
 0x14c   :  { %v801_v8 = vpop.eup %800 }
 0x14d   :  { %622 = vmatmul.mubr.f32.vlgmr.msra.gmra.mrb[0].mxu1 %v801_v8 }
 0x14e   :  { %691 = vmatprep.mubr.msk.f32.mxu1 %vm931_vm0, %v932_v1  ;;  %v767_v1 = vpack.c.bf16 %v372_v19, %v371_v18 }
 0x150   :  { %768 = vmatpush3.bf16.msra.mxu1 %v767_v1 }
 0x151   :  { %769 = vmatprep.subr.bf16.mxu1 %v930_v0 }
 0x154   :  { %771 = vmatpush3.bf16.msra.mxu1 %v770_v22 }
 0x155   :  { %772 = vmatprep.subr.bf16.mxu1 %v930_v0 }
 0x158   :  { %774 = vmatpush3.bf16.msra.mxu1 %v773_v25 }
 0x159   :  { %775 = vmatprep.subr.bf16.mxu1 %v930_v0 }
 0x15c   :  { %777 = vmatpush3.bf16.msra.mxu1 %v776_v28 }
 0x15d   :  { %778 = vmatprep.subr.bf16.mxu1 %v930_v0 }
 0x160   :  { %780 = vmatpush3.bf16.msra.mxu1 %v779_v31 }
 0x161   :  { %781 = vmatprep.subr.bf16.mxu1 %v930_v0 }
 0x164   :  { %783 = vmatpush3.bf16.msra.mxu1 %v782_v39 }
 0x165   :  { %784 = vmatprep.subr.bf16.mxu1 %v930_v0 }
 0x168   :  { %786 = vmatpush3.bf16.msra.mxu1 %v785_v42 }
 0x169   :  { %787 = vmatprep.subr.bf16.mxu1 %v930_v0 }
 0x16c   :  { %789 = vmatpush3.bf16.msra.mxu1 %v788_v45 }
 0x220   :  { %v272_v33 = vpop.f32.mrb[0].mxu1 }
 0x221   :  { %v273_v34 = vadd.f32 %v483_v32, %v272_v33  ;;  %v623_v35 = vpop.f32.mrb[1].mxu1 }
 0x223   :  { %802 = vtanh.f32 %v273_v34 }
 0x22d   :  { %v803_v36 = vpop.eup %802 }
 0x22e   :  { %657 = vmatmul.mubr.f32.vlgmr.msra.gmra.mrb[2].mxu0 %v803_v36 }
 0x301   :  { %v366_v47 = vpop.f32.mrb[2].mxu0 }
 0x302   :  { %v367_v48 = vadd.f32 %v484_v46, %v366_v47  ;;  %v658_v49 = vpop.f32.mrb[3].mxu0 }
 0x304   :  { %804 = vtanh.f32 %v367_v48 }
 0x30e   :  { %v805_v50 = vpop.eup %804 }
 0x30f   :  { %692 = vmatmul.mubr.f32.vlgmr.msra.gmra.mrb[2].mxu1 %v805_v50 }
 0x3e2   :  { %v460_v52 = vpop.f32.mrb[2].mxu1 }
 0x3e3   :  { %v461_v53 = vadd.f32 %v485_v51, %v460_v52  ;;  %v693_v0 = vpop.f32.mrb[3].mxu1 }
 0x3e5   :  { %464 = vst [vmem:[#allocation10] sm:$0xff] %v461_v53 }
 0x3e6   :  { %905 = shalt.err (!%p902_p8)
}
 0x3e7   :  { %s906_s26 = scalar_lea.hbm %s1134_s9, 128 }
 0x3e8   :  { %p907_p9 = scmp.ne.s32.totalorder %s1134_s9, %s906_s26  ;;  %p910_p10 = scmp.lt.u32.totalorder %s906_s26, %s1134_s9 }
 0x3ea   :  { %p912_p11 = pnand %p910_p10, %p907_p9 }
 0x3ec   :  { %915 = shalt.err (!%p912_p11)
}
 0x3ed   :  { %474 = dma.vmem_to_hbm [thread:$0]  %s472_s23, 128, %s1134_s9, [#allocation4]  }
 0x3ee   :  { %922 = dma.done.wait [#allocation4], 128  }
 0x3ef   :  { %923 = vsyncadd [#allocation4], 4294967168 }
 0x3f0   :  { %478 = vsyncpa [#allocation3], 1 }
 0x3f1   :  { %479 = vsyncpa [#allocation6], 1 }
 0x3f2   :  { %480 = vsyncpa [#allocation9], 1 }
 0x3f3   :  { %481 = vsyncpa [#allocation4], 1 }

</bundles_post_ra>
